<compile_context>
chip_gen: v6e
topology: v6e:2x2x1
jax: 0.10.0
libtpu: 0.0.40
codegen_flags: <defaults>
</compile_context>

<pallas_src>
import functools

import jax
import jax.numpy as jnp
from jax.experimental import pallas as pl
from jax.experimental.pallas import tpu as pltpu


def _auto_weight_bce_kernel(yhat_ref, y_ref, rowloss_ref,
                            p_acc, l0_acc, q_acc, s_acc, *,
                            nc, hw, rows_per_block, hw_block, inv_hw,
                            needs_row_mask, needs_col_mask):
    """Grid = (row blocks [parallel], spatial blocks [arbitrary]).

    yhat_ref / y_ref : (rows_per_block, hw_block) VMEM tiles
    rowloss_ref      : (rows_per_block, 1) f32 per-row losses for this row block
    *_acc            : (rows_per_block, 1) f32 VMEM accumulators (resident
                       across the spatial axis)
    """
    s_idx = pl.program_id(1)

    @pl.when(s_idx == 0)
    def _init():
        p_acc[...] = jnp.zeros_like(p_acc)
        l0_acc[...] = jnp.zeros_like(l0_acc)
        q_acc[...] = jnp.zeros_like(q_acc)
        s_acc[...] = jnp.zeros_like(s_acc)

    x = yhat_ref[...].astype(jnp.float32)
    y = y_ref[...].astype(jnp.float32)

    if needs_col_mask:
        # Last spatial block may extend past hw: padded lanes can hold
        # arbitrary (possibly NaN) data — select, don't multiply.
        col_ids = (s_idx * hw_block
                   + jax.lax.broadcasted_iota(jnp.int32,
                                              (rows_per_block, hw_block), 1))
        col_valid = col_ids < hw
        x = jnp.where(col_valid, x, 0.0)
        y = jnp.where(col_valid, y, 0.0)

    # Stable log-sigmoid; one exp + one log1p per element serves both logits:
    #   logit_0 = logsigmoid(-x) = -max(x, 0) - log1p(exp(-|x|))
    #   logit_1 = logsigmoid( x) = logit_0 + x      (never materialized)
    logit_0 = -jnp.maximum(x, 0.0) - jnp.log1p(jnp.exp(-jnp.abs(x)))
    if needs_col_mask:
        logit_0 = jnp.where(col_valid, logit_0, 0.0)  # logit_0(0) != 0

    # Row-factored partial sums (beta applied per row at the end):
    #   P = sum(logit_0*y), L0 = sum(logit_0), Q = sum(x*y), S = sum(y)
    p_acc[...] += jnp.sum(logit_0 * y, axis=1, keepdims=True)
    l0_acc[...] += jnp.sum(logit_0, axis=1, keepdims=True)
    q_acc[...] += jnp.sum(x * y, axis=1, keepdims=True)
    s_acc[...] += jnp.sum(y, axis=1, keepdims=True)

    @pl.when(s_idx == pl.num_programs(1) - 1)
    def _finalize():
        p = p_acc[...]
        a = p + q_acc[...]            # sum(logit_1 * y)
        b = l0_acc[...] - p           # sum(logit_0 * (1 - y))
        s = s_acc[...]
        if needs_row_mask:
            # Last row block may extend past nc; padded rows can hold garbage
            # (possibly NaN) — select after the reductions so it cannot leak.
            row_ids = (pl.program_id(0) * rows_per_block
                       + jax.lax.broadcasted_iota(jnp.int32,
                                                  (rows_per_block, 1), 0))
            valid = row_ids < nc
            a = jnp.where(valid, a, 0.0)
            b = jnp.where(valid, b, 0.0)
            s = jnp.where(valid, s, 0.0)
        beta = s * inv_hw             # per-(n, c) spatial mean of y
        rowloss_ref[...] = -(1.0 - beta) * a - beta * b


def auto_weight_bce(y_hat_log, y):
    """Pallas implementation of auto_weight_bce.forward (scalar mean loss)."""
    assert y_hat_log.shape == y.shape
    n, c, h, w = y_hat_log.shape
    nc = n * c
    hw = h * w

    # Keep the caller's dtypes (kernel upcasts to f32 internally).
    yh2 = y_hat_log.reshape(nc, hw)
    y2 = y.reshape(nc, hw)

    item_yh = jnp.dtype(yh2.dtype).itemsize
    item_y = jnp.dtype(y2.dtype).itemsize
    max_item = max(item_yh, item_y)

    # Sublane packing multiple per input dtype (f32 -> 8, bf16 -> 16, int8 -> 32).
    sub = max(max(8, 32 // item_yh), max(8, 32 // item_y))

    # ---- block sizing: ~2 MiB per input block (HBM-bound sweet spot) ----
    target_block_bytes = 2 << 20

    # Spatial (lane) axis: full hw if it fits with at least `sub` rows,
    # otherwise a multiple-of-128 chunk.
    hw_block_cap = max(128, target_block_bytes // (sub * max_item))
    if hw <= hw_block_cap:
        hw_block = hw
    else:
        hw_block = (hw_block_cap // 128) * 128
    grid_s = pl.cdiv(hw, hw_block)
    needs_col_mask = (grid_s * hw_block) != hw

    # Row (sublane) axis.
    rows_cap = max(1, target_block_bytes // (hw_block * max_item))
    if nc <= sub:
        rows_per_block = nc                      # full extent (always legal)
    else:
        rows_per_block = min(nc, rows_cap)
        rows_per_block = max(sub, (rows_per_block // sub) * sub)
        # v7x: keep >= 2 balanced row blocks so the parallel axis can be
        # sharded across both TensorCores.
        if nc >= 2 * sub:
            half = sub * pl.cdiv(pl.cdiv(nc, 2), sub)
            rows_per_block = min(rows_per_block, half)
    grid_r = pl.cdiv(nc, rows_per_block)
    needs_row_mask = (grid_r * rows_per_block) != nc
    nc_pad = grid_r * rows_per_block

    # ---- VMEM budget: double-buffered input tiles + f32 intermediates ----
    in_block_bytes = rows_per_block * hw_block * (item_yh + item_y)
    f32_block_bytes = rows_per_block * hw_block * 4
    scratch_bytes = 4 * rows_per_block * 128 * 4      # lane-padded accumulators
    vmem_needed = (2 * in_block_bytes          # 2x pipeline buffers per input
                   + 5 * f32_block_bytes       # astype copies + elementwise temps
                   + scratch_bytes
                   + (8 << 20))                # headroom
    try:
        vmem_cap = int(pltpu.get_tpu_info().vmem_capacity_bytes)
    except Exception:
        vmem_cap = 64 * 1024 * 1024            # v7x-safe fallback
    vmem_limit = int(min(max(vmem_needed, 16 << 20), (vmem_cap * 3) // 4))

    kernel = functools.partial(
        _auto_weight_bce_kernel,
        nc=nc, hw=hw,
        rows_per_block=rows_per_block, hw_block=hw_block,
        inv_hw=1.0 / hw,
        needs_row_mask=needs_row_mask, needs_col_mask=needs_col_mask,
    )

    row_losses = pl.pallas_call(
        kernel,
        out_shape=jax.ShapeDtypeStruct((nc_pad, 1), jnp.float32),
        grid_spec=pltpu.PrefetchScalarGridSpec(
            num_scalar_prefetch=0,
            grid=(grid_r, grid_s),
            in_specs=[
                pl.BlockSpec((rows_per_block, hw_block), lambda r, s: (r, s)),
                pl.BlockSpec((rows_per_block, hw_block), lambda r, s: (r, s)),
            ],
            # Output block is revisited across the spatial axis and written
            # only at the last spatial step (once per row block).
            out_specs=pl.BlockSpec((rows_per_block, 1), lambda r, s: (r, 0)),
            scratch_shapes=[pltpu.VMEM((rows_per_block, 1), jnp.float32)] * 4,
        ),
        compiler_params=pltpu.CompilerParams(
            dimension_semantics=("parallel", "arbitrary"),
            vmem_limit_bytes=vmem_limit,
        ),
    )(yh2, y2)

    # loss.mean() over all N*C*H*W elements (padded rows contribute 0).
    total = jnp.sum(row_losses)
    return (total / jnp.float32(nc * hw)).astype(jnp.float32)


def _reference(y_hat_log, y):
    beta = jnp.mean(y, axis=(2, 3), keepdims=True)
    logit_1 = jax.nn.log_sigmoid(y_hat_log)
    logit_0 = jax.nn.log_sigmoid(-y_hat_log)
    loss = -(1.0 - beta) * logit_1 * y - beta * logit_0 * (1.0 - y)
    return jnp.mean(loss)


if __name__ == "__main__":
    key = jax.random.PRNGKey(0)
    k1, k2 = jax.random.split(key)

    N, C, H, W = 2, 4, 16, 16  # NCHW, consistent with the PyTorch forward
    y_hat_log = jax.random.normal(k1, (N, C, H, W), dtype=jnp.float32)
    # Binary-ish targets in [0, 1]
    y = (jax.random.uniform(k2, (N, C, H, W), dtype=jnp.float32) > 0.5).astype(
        jnp.float32
    )

    out = jax.block_until_ready(auto_weight_bce(y_hat_log, y))
    ref = jax.block_until_ready(_reference(y_hat_log, y))

    assert jnp.allclose(out, ref, rtol=1e-5, atol=1e-6), (out, ref)
    print("KERNEL_OK")
</pallas_src>

<mosaic_0001>
module attributes {stable_mosaic.version = 11 : i64} {
  func.func @_auto_weight_bce_kernel(%arg0: i32, %arg1: i32, %arg2: memref<8x256xf32, #tpu.memory_space<vmem>>, %arg3: memref<8x256xf32, #tpu.memory_space<vmem>>, %arg4: memref<8x1xf32, #tpu.memory_space<vmem>>, %arg5: memref<8x1xf32, #tpu.memory_space<vmem>>, %arg6: memref<8x1xf32, #tpu.memory_space<vmem>>, %arg7: memref<8x1xf32, #tpu.memory_space<vmem>>, %arg8: memref<8x1xf32, #tpu.memory_space<vmem>>) attributes {dimension_semantics = [#tpu.dimension_semantics<parallel>, #tpu.dimension_semantics<arbitrary>], iteration_bounds = array<i64: 1, 1>, scalar_prefetch = 0 : i64, scratch_operands = 4 : i64, tpu.core_type = #tpu.core_type<tc>, window_params = [{transform_indices = @transform_0, window_bounds = array<i64: 8, 256>}, {transform_indices = @transform_1, window_bounds = array<i64: 8, 256>}, {transform_indices = @transform_2, window_bounds = array<i64: 8, 1>}]} {
    %c0_i32 = arith.constant 0 : i32
    %0 = arith.cmpi eq, %arg1, %c0_i32 : i32
    %1 = arith.extui %0 : i1 to i32
    %c0_i32_0 = arith.constant 0 : i32
    %2 = arith.cmpi ne, %1, %c0_i32_0 : i32
    scf.if %2 {
      %cst_28 = arith.constant 0.000000e+00 : f32
      %40 = vector.broadcast %cst_28 : f32 to vector<8x1xf32>
      %c0_29 = arith.constant 0 : index
      %c0_30 = arith.constant 0 : index
      %41 = vector.load %arg5[%c0_29, %c0_30] : memref<8x1xf32, #tpu.memory_space<vmem>>, vector<8x1xf32>
      tpu.vector_store %arg5[%c0_29, %c0_30], %40 {strides = array<i32>} : memref<8x1xf32, #tpu.memory_space<vmem>>, vector<8x1xf32>,
      %cst_31 = arith.constant 0.000000e+00 : f32
      %42 = vector.broadcast %cst_31 : f32 to vector<8x1xf32>
      %c0_32 = arith.constant 0 : index
      %c0_33 = arith.constant 0 : index
      %43 = vector.load %arg6[%c0_32, %c0_33] : memref<8x1xf32, #tpu.memory_space<vmem>>, vector<8x1xf32>
      tpu.vector_store %arg6[%c0_32, %c0_33], %42 {strides = array<i32>} : memref<8x1xf32, #tpu.memory_space<vmem>>, vector<8x1xf32>,
      %cst_34 = arith.constant 0.000000e+00 : f32
      %44 = vector.broadcast %cst_34 : f32 to vector<8x1xf32>
      %c0_35 = arith.constant 0 : index
      %c0_36 = arith.constant 0 : index
      %45 = vector.load %arg7[%c0_35, %c0_36] : memref<8x1xf32, #tpu.memory_space<vmem>>, vector<8x1xf32>
      tpu.vector_store %arg7[%c0_35, %c0_36], %44 {strides = array<i32>} : memref<8x1xf32, #tpu.memory_space<vmem>>, vector<8x1xf32>,
      %cst_37 = arith.constant 0.000000e+00 : f32
      %46 = vector.broadcast %cst_37 : f32 to vector<8x1xf32>
      %c0_38 = arith.constant 0 : index
      %c0_39 = arith.constant 0 : index
      %47 = vector.load %arg8[%c0_38, %c0_39] : memref<8x1xf32, #tpu.memory_space<vmem>>, vector<8x1xf32>
      tpu.vector_store %arg8[%c0_38, %c0_39], %46 {strides = array<i32>} : memref<8x1xf32, #tpu.memory_space<vmem>>, vector<8x1xf32>,
    } else {
    }
    %c0 = arith.constant 0 : index
    %c0_1 = arith.constant 0 : index
    %3 = vector.load %arg2[%c0, %c0_1] : memref<8x256xf32, #tpu.memory_space<vmem>>, vector<8x256xf32>
    %c0_2 = arith.constant 0 : index
    %c0_3 = arith.constant 0 : index
    %4 = vector.load %arg3[%c0_2, %c0_3] : memref<8x256xf32, #tpu.memory_space<vmem>>, vector<8x256xf32>
    %cst = arith.constant 0.000000e+00 : f32
    %5 = vector.broadcast %cst : f32 to vector<8x256xf32>
    %6 = arith.maximumf %3, %5 : vector<8x256xf32>
    %cst_4 = arith.constant 0.000000e+00 : f32
    %7 = vector.broadcast %cst_4 : f32 to vector<8x256xf32>
    %8 = arith.subf %7, %6 : vector<8x256xf32>
    %9 = math.absf %3 : vector<8x256xf32>
    %cst_5 = arith.constant 0.000000e+00 : f32
    %10 = vector.broadcast %cst_5 : f32 to vector<8x256xf32>
    %11 = arith.subf %10, %9 : vector<8x256xf32>
    %12 = math.exp %11 : vector<8x256xf32>
    %13 = math.log1p %12 : vector<8x256xf32>
    %14 = arith.subf %8, %13 : vector<8x256xf32>
    %c0_6 = arith.constant 0 : index
    %c0_7 = arith.constant 0 : index
    %15 = vector.load %arg5[%c0_6, %c0_7] : memref<8x1xf32, #tpu.memory_space<vmem>>, vector<8x1xf32>
    %16 = arith.mulf %14, %4 : vector<8x256xf32>
    %cst_8 = arith.constant dense<0.000000e+00> : vector<8xf32>
    %17 = vector.multi_reduction <add>, %16, %cst_8 [1] : vector<8x256xf32> to vector<8xf32>
    %18 = vector.shape_cast %17 : vector<8xf32> to vector<8x1xf32>
    %19 = arith.addf %15, %18 : vector<8x1xf32>
    %c0_9 = arith.constant 0 : index
    %c0_10 = arith.constant 0 : index
    %20 = vector.load %arg5[%c0_9, %c0_10] : memref<8x1xf32, #tpu.memory_space<vmem>>, vector<8x1xf32>
    tpu.vector_store %arg5[%c0_9, %c0_10], %19 {strides = array<i32>} : memref<8x1xf32, #tpu.memory_space<vmem>>, vector<8x1xf32>,
    %c0_11 = arith.constant 0 : index
    %c0_12 = arith.constant 0 : index
    %21 = vector.load %arg6[%c0_11, %c0_12] : memref<8x1xf32, #tpu.memory_space<vmem>>, vector<8x1xf32>
    %cst_13 = arith.constant dense<0.000000e+00> : vector<8xf32>
    %22 = vector.multi_reduction <add>, %14, %cst_13 [1] : vector<8x256xf32> to vector<8xf32>
    %23 = vector.shape_cast %22 : vector<8xf32> to vector<8x1xf32>
    %24 = arith.addf %21, %23 : vector<8x1xf32>
    %c0_14 = arith.constant 0 : index
    %c0_15 = arith.constant 0 : index
    %25 = vector.load %arg6[%c0_14, %c0_15] : memref<8x1xf32, #tpu.memory_space<vmem>>, vector<8x1xf32>
    tpu.vector_store %arg6[%c0_14, %c0_15], %24 {strides = array<i32>} : memref<8x1xf32, #tpu.memory_space<vmem>>, vector<8x1xf32>,
    %c0_16 = arith.constant 0 : index
    %c0_17 = arith.constant 0 : index
    %26 = vector.load %arg7[%c0_16, %c0_17] : memref<8x1xf32, #tpu.memory_space<vmem>>, vector<8x1xf32>
    %27 = arith.mulf %3, %4 : vector<8x256xf32>
    %cst_18 = arith.constant dense<0.000000e+00> : vector<8xf32>
    %28 = vector.multi_reduction <add>, %27, %cst_18 [1] : vector<8x256xf32> to vector<8xf32>
    %29 = vector.shape_cast %28 : vector<8xf32> to vector<8x1xf32>
    %30 = arith.addf %26, %29 : vector<8x1xf32>
    %c0_19 = arith.constant 0 : index
    %c0_20 = arith.constant 0 : index
    %31 = vector.load %arg7[%c0_19, %c0_20] : memref<8x1xf32, #tpu.memory_space<vmem>>, vector<8x1xf32>
    tpu.vector_store %arg7[%c0_19, %c0_20], %30 {strides = array<i32>} : memref<8x1xf32, #tpu.memory_space<vmem>>, vector<8x1xf32>,
    %c0_21 = arith.constant 0 : index
    %c0_22 = arith.constant 0 : index
    %32 = vector.load %arg8[%c0_21, %c0_22] : memref<8x1xf32, #tpu.memory_space<vmem>>, vector<8x1xf32>
    %cst_23 = arith.constant dense<0.000000e+00> : vector<8xf32>
    %33 = vector.multi_reduction <add>, %4, %cst_23 [1] : vector<8x256xf32> to vector<8xf32>
    %34 = vector.shape_cast %33 : vector<8xf32> to vector<8x1xf32>
    %35 = arith.addf %32, %34 : vector<8x1xf32>
    %c0_24 = arith.constant 0 : index
    %c0_25 = arith.constant 0 : index
    %36 = vector.load %arg8[%c0_24, %c0_25] : memref<8x1xf32, #tpu.memory_space<vmem>>, vector<8x1xf32>
    tpu.vector_store %arg8[%c0_24, %c0_25], %35 {strides = array<i32>} : memref<8x1xf32, #tpu.memory_space<vmem>>, vector<8x1xf32>,
    %c0_i32_26 = arith.constant 0 : i32
    %37 = arith.cmpi eq, %arg1, %c0_i32_26 : i32
    %38 = arith.extui %37 : i1 to i32
    %c0_i32_27 = arith.constant 0 : i32
    %39 = arith.cmpi ne, %38, %c0_i32_27 : i32
    scf.if %39 {
      %c0_28 = arith.constant 0 : index
      %c0_29 = arith.constant 0 : index
      %40 = vector.load %arg5[%c0_28, %c0_29] : memref<8x1xf32, #tpu.memory_space<vmem>>, vector<8x1xf32>
      %c0_30 = arith.constant 0 : index
      %c0_31 = arith.constant 0 : index
      %41 = vector.load %arg7[%c0_30, %c0_31] : memref<8x1xf32, #tpu.memory_space<vmem>>, vector<8x1xf32>
      %42 = arith.addf %40, %41 : vector<8x1xf32>
      %c0_32 = arith.constant 0 : index
      %c0_33 = arith.constant 0 : index
      %43 = vector.load %arg6[%c0_32, %c0_33] : memref<8x1xf32, #tpu.memory_space<vmem>>, vector<8x1xf32>
      %44 = arith.subf %43, %40 : vector<8x1xf32>
      %c0_34 = arith.constant 0 : index
      %c0_35 = arith.constant 0 : index
      %45 = vector.load %arg8[%c0_34, %c0_35] : memref<8x1xf32, #tpu.memory_space<vmem>>, vector<8x1xf32>
      %cst_36 = arith.constant 3.906250e-03 : f32
      %46 = vector.broadcast %cst_36 : f32 to vector<8x1xf32>
      %47 = arith.mulf %45, %46 : vector<8x1xf32>
      %cst_37 = arith.constant 1.000000e+00 : f32
      %48 = vector.broadcast %cst_37 : f32 to vector<8x1xf32>
      %49 = arith.subf %48, %47 : vector<8x1xf32>
      %cst_38 = arith.constant 0.000000e+00 : f32
      %50 = vector.broadcast %cst_38 : f32 to vector<8x1xf32>
      %51 = arith.subf %50, %49 : vector<8x1xf32>
      %52 = arith.mulf %51, %42 : vector<8x1xf32>
      %53 = arith.mulf %47, %44 : vector<8x1xf32>
      %54 = arith.subf %52, %53 : vector<8x1xf32>
      %c0_39 = arith.constant 0 : index
      %c0_40 = arith.constant 0 : index
      %55 = vector.load %arg4[%c0_39, %c0_40] : memref<8x1xf32, #tpu.memory_space<vmem>>, vector<8x1xf32>
      tpu.vector_store %arg4[%c0_39, %c0_40], %54 {strides = array<i32>} : memref<8x1xf32, #tpu.memory_space<vmem>>, vector<8x1xf32>,
    } else {
    }
    return
  }
  func.func @transform_0(%arg0: i32, %arg1: i32) -> (i32, i32) {
    %c0_i32 = arith.constant 0 : i32
    return %arg0, %arg1 : i32, i32
  }
  func.func @transform_1(%arg0: i32, %arg1: i32) -> (i32, i32) {
    %c0_i32 = arith.constant 0 : i32
    return %arg0, %arg1 : i32, i32
  }
  func.func @transform_2(%arg0: i32, %arg1: i32) -> (i32, i32) {
    %c0_i32 = arith.constant 0 : i32
    %c0_i32_0 = arith.constant 0 : i32
    return %arg0, %c0_i32 : i32, i32
  }
}

</mosaic_0001>

<bundles_post_ra>
// kernel: tpu_custom_call.1
= control target key start
LH: loop header
LB: loop body
LE: loop exit
PB: predicated region body
PF: predicated region fallthrough
CT: control target
= control target key end

     0   :  { %7 = vsyncpa [#allocation7], 0  ;;  %s222_s0 = inlined_call_operand.hbm [shape: f32[8,256], index: 0, kind: input, shape index: {}]   ;;  %s223_s1 = inlined_call_operand.hbm [shape: f32[8,256], index: 1, kind: input, shape index: {}]   ;;  %s224_s2 = inlined_call_operand.vmem [shape: f32[8,1], index: 2, kind: output, shape index: {}]  }
   0x1   :  { %8 = vsyncpa [#allocation9], 0  ;;  %s186_s9 = smov [#allocation6]   ;;  %s187_s11 = smov [#allocation8]  }
   0x2   :  { %s15_s10 = sshll.u32 %s186_s9, 4  ;;  %s25_s12 = sshll.u32 %s187_s11, 4  ;;  %s16_s10 = int_to_ptr.vmem [resolvable:$true] %s15_s10  ;;  %s26_s12 = int_to_ptr.vmem [resolvable:$true] %s25_s12 }
   0x3   :  { %s150_s13 = scalar_lea.vmem %s16_s10, 256  ;;  %p155_p1 = scmp.lt.s32.totalorder %s16_s10, %s16_s10 }
   0x4   :  { %p151_p0 = scmp.ne.s32.totalorder %s16_s10, %s150_s13  ;;  %p156_p2 = scmp.lt.s32.totalorder %s150_s13, %s150_s13 }
   0x6   :  { %p157_p3 = por %p156_p2, %p155_p1 }
   0x8   :  { %p158_p4 = pnand %p157_p3, %p151_p0 }
   0xa   :  { %161 = shalt.err (!%p158_p4)
}
   0xb   :  { %18 = dma.hbm_to_vmem [thread:$0]  %s222_s0, 256, %s16_s10, [#allocation7]  }
   0xc   :  { %s170_s16 = scalar_lea.vmem %s26_s12, 256  ;;  %p175_p6 = scmp.lt.s32.totalorder %s26_s12, %s26_s12 }
   0xd   :  { %p171_p5 = scmp.ne.s32.totalorder %s26_s12, %s170_s16  ;;  %p176_p7 = scmp.lt.s32.totalorder %s170_s16, %s170_s16 }
   0xf   :  { %p177_p8 = por %p176_p7, %p175_p6 }
  0x11   :  { %p178_p9 = pnand %p177_p8, %p171_p5 }
  0x13   :  { %181 = shalt.err (!%p178_p9)
}
  0x14   :  { %28 = dma.hbm_to_vmem [thread:$0]  %s223_s1, 256, %s26_s12, [#allocation9]  }
  0x15   :  { %182 = dma.done.wait [#allocation7], 256  }
  0x16   :  { %183 = vsyncadd [#allocation7], 4294967040 }
  0x17   :  { %184 = dma.done.wait [#allocation9], 256  }
  0x18   :  { %185 = vsyncadd [#allocation9], 4294967040  ;;  %vm39_vm0 = vcmask 7168   ;;  %v188_v0 = vmov 0.0   ;;  %v46_v1 = vld [vmem:[#allocation8] sm:$0xff]  ;;  %v47_v2 = vld [vmem:[#allocation8 + $0x8] sm:$0xff] }
  0x19   :  { %43 = vst.msk [vmem:[#allocation5] sm:$0xff] %vm39_vm0, %v188_v0  ;;  %40 = vst.msk [vmem:[#allocation2] sm:$0xff] %vm39_vm0, %v188_v0  ;;  %v44_v3 = vld [vmem:[#allocation6] sm:$0xff]  ;;  %v104_v4 = vadd.f32 %v47_v2, %v46_v1  ;;  %v45_v5 = vld [vmem:[#allocation6 + $0x8] sm:$0xff] }
  0x1a   :  { %41 = vst.msk [vmem:[#allocation3] sm:$0xff] %vm39_vm0, %v188_v0  ;;  %42 = vst.msk [vmem:[#allocation4] sm:$0xff] %vm39_vm0, %v188_v0  ;;  %v52_v6 = vand.u32 2147483647, %v44_v3  ;;  %v53_v7 = vand.u32 2147483647, %v45_v5  ;;  %v96_v36 = vmul.f32 %v46_v1, %v44_v3  ;;  %v97_v37 = vmul.f32 %v47_v2, %v45_v5 }
  0x1b   :  { %105 = vadd.xlane.f32.xlu0 %v104_v4  ;;  %v48_v19 = vmax.f32 %v44_v3, 0.0  ;;  %v49_v22 = vmax.f32 %v45_v5, 0.0 }
  0x1c   :  { %v54_v8 = vsub.f32 0.0, %v52_v6  ;;  %v55_v9 = vsub.f32 0.0, %v53_v7  ;;  %v98_v42 = vadd.f32 %v97_v37, %v96_v36 }
  0x1d   :  { %v50_v26 = vsub.f32 0.0, %v48_v19  ;;  %v51_v29 = vsub.f32 0.0, %v49_v22 }
  0x1e   :  { %v56_v10 = vmul.f32 1.442695, %v54_v8  ;;  %v58_v11 = vmul.f32 1.442695, %v55_v9 }
  0x20   :  { %134 = vpow2.f32 %v56_v10  ;;  %v103_v43 = vld [vmem:[#allocation5] sm:$0xff]  ;;  %v80_v48 = vld [vmem:[#allocation2] sm:$0xff] }
  0x21   :  { %136 = vpow2.f32 %v58_v11  ;;  %v89_v46 = vld [vmem:[#allocation3] sm:$0xff]  ;;  %v95_v52 = vld [vmem:[#allocation4] sm:$0xff] }
  0x2d   :  { %v135_v12 = vpop.eup %134 }
  0x2e   :  { %v137_v13 = vpop.eup %136  ;;  %v60_v14 = vadd.f32 1.0, %v135_v12  ;;  %v63_v16 = vmul.f32 -0.5, %v135_v12  ;;  %v66_v20 = vand.u32 2147483647, %v135_v12 }
  0x2f   :  { %v69_v15 = vadd.f32 1.0, %v137_v13  ;;  %v72_v17 = vmul.f32 -0.5, %v137_v13  ;;  %v75_v23 = vand.u32 2147483647, %v137_v13 }
  0x30   :  { %138 = vlog2.f32 %v60_v14  ;;  %v64_v18 = vadd.f32 1.0, %v63_v16  ;;  %vm67_vm1 = vcmp.lt.f32.partialorder %v66_v20, 0.0004427343 }
  0x31   :  { %140 = vlog2.f32 %v69_v15  ;;  %v73_v21 = vadd.f32 1.0, %v72_v17  ;;  %vm76_vm2 = vcmp.lt.f32.partialorder %v75_v23, 0.0004427343 }
  0x32   :  { %v65_v24 = vmul.f32 %v135_v12, %v64_v18 }
  0x33   :  { %v74_v27 = vmul.f32 %v137_v13, %v73_v21 }
  0x3d   :  { %v139_v25 = vpop.eup %138 }
  0x3e   :  { %v141_v28 = vpop.eup %140  ;;  %v62_v30 = vmul.f32 0.6931472, %v139_v25 }
  0x3f   :  { %v71_v31 = vmul.f32 0.6931472, %v141_v28 }
  0x40   :  { %v68_v32 = vsel %vm67_vm1, %v65_v24, %v62_v30 }
  0x41   :  { %v77_v33 = vsel %vm76_vm2, %v74_v27, %v71_v31  ;;  %v78_v34 = vsub.f32 %v50_v26, %v68_v32 }
  0x42   :  { %v79_v35 = vsub.f32 %v51_v29, %v77_v33 }
  0x43   :  { %v81_v38 = vmul.f32 %v78_v34, %v46_v1 }
  0x44   :  { %v90_v39 = vadd.f32 %v79_v35, %v78_v34  ;;  %v82_v40 = vmul.f32 %v79_v35, %v47_v2 }
  0x46   :  { %91 = vadd.xlane.f32.xlu1 %v90_v39  ;;  %v83_v41 = vadd.f32 %v82_v40, %v81_v38 }
  0x48   :  { %84 = vadd.xlane.f32.xlu0 %v83_v41 }
  0x4a   :  { %99 = vadd.xlane.f32.xlu1 %v98_v42 }
  0xa4   :  { %v106_v44 = vpop.xlane.xlu0 %105 }
  0xa5   :  { %v107_v45 = vadd.f32 %v106_v44, %v103_v43 }
  0xa7   :  { %108 = vst.msk [vmem:[#allocation5] sm:$0xff] %vm39_vm0, %v107_v45 }
  0xae   :  { %v117_v50 = vld [vmem:[#allocation5] sm:$0xff] }
  0xaf   :  { %v118_v55 = vmul.f32 0.00390625, %v117_v50 }
  0xb1   :  { %v119_v57 = vsub.f32 1.0, %v118_v55 }
  0xb3   :  { %v120_v60 = vsub.f32 0.0, %v119_v57 }
  0xcf   :  { %v92_v47 = vpop.xlane.xlu1 %91 }
  0xd0   :  { %v93_v49 = vadd.f32 %v92_v47, %v89_v46 }
  0xd1   :  { %v85_v51 = vpop.xlane.xlu0 %84 }
  0xd2   :  { %94 = vst.msk [vmem:[#allocation3] sm:$0xff] %vm39_vm0, %v93_v49  ;;  %v86_v53 = vadd.f32 %v85_v51, %v80_v48 }
  0xd3   :  { %v100_v54 = vpop.xlane.xlu1 %99 }
  0xd4   :  { %88 = vst.msk [vmem:[#allocation2] sm:$0xff] %vm39_vm0, %v86_v53  ;;  %v101_v56 = vadd.f32 %v100_v54, %v95_v52 }
  0xd6   :  { %102 = vst.msk [vmem:[#allocation4] sm:$0xff] %vm39_vm0, %v101_v56 }
  0xd9   :  { %v115_v58 = vld [vmem:[#allocation3] sm:$0xff] }
  0xdb   :  { %v112_v59 = vld [vmem:[#allocation2] sm:$0xff] }
  0xdc   :  { %v116_v61 = vsub.f32 %v115_v58, %v112_v59 }
  0xdd   :  { %v113_v62 = vld [vmem:[#allocation4] sm:$0xff] }
  0xde   :  { %v114_v63 = vadd.f32 %v113_v62, %v112_v59  ;;  %v122_v0 = vmul.f32 %v118_v55, %v116_v61 }
  0xe0   :  { %v121_v1 = vmul.f32 %v120_v60, %v114_v63 }
  0xe2   :  { %v123_v2 = vsub.f32 %v121_v1, %v122_v0 }
  0xe4   :  { %124 = vst.msk [vmem:[%s224_s2] sm:$0xff] %vm39_vm0, %v123_v2 }
  0xe5   :  { %129 = vsyncpa [#allocation7], 1 }
  0xe6   :  { %130 = vsyncpa [#allocation9], 1 }

</bundles_post_ra>
